<compile_context>
chip_gen: v5e
topology: v5e:2x2
jax: 0.10.0
libtpu: 0.0.40
codegen_flags: <defaults>
</compile_context>

<pallas_src>
import jax
import jax.numpy as jnp
from jax.experimental import pallas as pl
from jax.experimental.pallas import tpu as pltpu

BN_EPS = 1e-5
# Output width of each linear layer as seen by the kernel.  Only the final action
# head is padded (action_size -> 128); internal widths stay unpadded.
LAYER_WIDTHS = (256, 324, 512, 128, 128)
MAX_WIDTH = max(LAYER_WIDTHS)
TILE_B = 128                 # batch tile for the grid path (multiple of 16 for bf16 sublanes)
GRID_MIN_BATCH = 2 * TILE_B  # below this, a batch grid is pure per-step overhead


def qnetwork_kernel(x_ref, w1_ref, w2_ref, w3_ref, w4_ref, w5_ref, b_ref, out_ref):
    """Fused 5-layer MLP. Weights are bf16 (BN pre-folded), biases packed in b_ref."""

    def layer(h, w_ref, row, width):
        # bf16 x bf16 matmul on the MXU with f32 accumulation.
        z = jnp.dot(
            h.astype(jnp.bfloat16), w_ref[...], preferred_element_type=jnp.float32
        )
        z = z + b_ref[row : row + 1, 0:width]
        return jnp.maximum(z, 0.0)

    h = x_ref[...]
    h = layer(h, w1_ref, 0, LAYER_WIDTHS[0])  # l1 + bn1 + relu (+ dropout eval = id)
    h = layer(h, w2_ref, 1, LAYER_WIDTHS[1])  # l2 + bn2 + relu (324 kept unpadded)
    h = layer(h, w3_ref, 2, LAYER_WIDTHS[2])  # l3 + bn3 + relu
    h = layer(h, w4_ref, 3, LAYER_WIDTHS[3])  # l4 + bn4 + relu
    out_ref[...] = layer(h, w5_ref, 4, LAYER_WIDTHS[4])  # l5 + relu (padded to 128)


def _cost_estimate(batch, kernel_params):
    *ws, b_packed = kernel_params
    flops = 2 * batch * sum(int(w.shape[0]) * int(w.shape[1]) for w in ws)
    bytes_accessed = (
        sum(int(w.size) * w.dtype.itemsize for w in ws)
        + int(b_packed.size) * b_packed.dtype.itemsize
        + batch * int(ws[0].shape[0]) * 4   # x (f32)
        + batch * LAYER_WIDTHS[-1] * 4      # out (f32)
    )
    return pl.CostEstimate(flops=flops, bytes_accessed=bytes_accessed, transcendentals=0)


def qnetwork_forward(x, kernel_params, action_size):
    """Run the Pallas kernel; returns [batch, action_size] Q-values."""
    batch, state_size = x.shape
    out_width = LAYER_WIDTHS[-1]
    cost = _cost_estimate(batch, kernel_params)

    if batch < GRID_MIN_BATCH:
        # Gridless path: all operands resident in VMEM, single invocation.
        vmem = pl.BlockSpec(memory_space=pltpu.MemorySpace.VMEM)
        out_padded = pl.pallas_call(
            qnetwork_kernel,
            out_shape=jax.ShapeDtypeStruct((batch, out_width), jnp.float32),
            in_specs=[vmem] * (1 + len(kernel_params)),
            out_specs=vmem,
            cost_estimate=cost,
        )(x, *kernel_params)
        return out_padded[:, :action_size]

    # Grid path: tile the batch.  Weights/biases use a constant index_map so they are
    # DMA'd once and stay resident; "parallel" lets v7x's two TCs split the tiles.
    padded_batch = pl.cdiv(batch, TILE_B) * TILE_B
    if padded_batch != batch:
        x = jnp.pad(x, ((0, padded_batch - batch), (0, 0)))
    n_tiles = padded_batch // TILE_B

    resident_specs = [
        pl.BlockSpec(tuple(p.shape), lambda i: (0, 0)) for p in kernel_params
    ]
    out_padded = pl.pallas_call(
        qnetwork_kernel,
        out_shape=jax.ShapeDtypeStruct((padded_batch, out_width), jnp.float32),
        grid=(n_tiles,),
        in_specs=[pl.BlockSpec((TILE_B, state_size), lambda i: (i, 0))] + resident_specs,
        out_specs=pl.BlockSpec((TILE_B, out_width), lambda i: (i, 0)),
        cost_estimate=cost,
        compiler_params=pltpu.CompilerParams(dimension_semantics=("parallel",)),
    )(x, *kernel_params)
    return out_padded[:batch, :action_size]


# ---------------------------------------------------------------------------
# Parameter construction (PyTorch-default-like init) + offline BN folding/padding.
# ---------------------------------------------------------------------------
def init_raw_params(key, state_size, action_size):
    """Linear: U(-1/sqrt(fan_in), 1/sqrt(fan_in)); BN: gamma=1, beta=0, rm=0, rv=1.
    Weights stored as [in, out] (transposed vs. torch's [out, in])."""
    dims = [state_size, 256, 324, 512, 128, action_size]
    layers = []
    for i in range(5):
        fan_in, fan_out = dims[i], dims[i + 1]
        key, kw, kb = jax.random.split(key, 3)
        bound = 1.0 / (fan_in ** 0.5)
        w = jax.random.uniform(kw, (fan_in, fan_out), jnp.float32, -bound, bound)
        b = jax.random.uniform(kb, (fan_out,), jnp.float32, -bound, bound)
        layers.append((w, b))
    bns = []
    for width in (256, 324, 512, 128):
        bns.append(
            (
                jnp.ones((width,), jnp.float32),   # gamma
                jnp.zeros((width,), jnp.float32),  # beta
                jnp.zeros((width,), jnp.float32),  # running_mean
                jnp.ones((width,), jnp.float32),   # running_var
            )
        )
    return layers, bns


def prepare_kernel_params(layers, bns):
    """Fold eval-mode BN into W/b, pad only the action head to 128 lanes, cast W to
    bf16, and pack all biases into a single [5, MAX_WIDTH] f32 array."""
    ws, bs = [], []
    for i, (w, b) in enumerate(layers):
        if i < 4:
            gamma, beta, rm, rv = bns[i]
            scale = gamma * jax.lax.rsqrt(rv + BN_EPS)
            w = w * scale[None, :]
            b = (b - rm) * scale + beta
        col_pad = LAYER_WIDTHS[i] - w.shape[1]
        if col_pad:
            w = jnp.pad(w, ((0, 0), (0, col_pad)))
            b = jnp.pad(b, (0, col_pad))
        if i > 0:
            row_pad = LAYER_WIDTHS[i - 1] - w.shape[0]
            if row_pad:
                w = jnp.pad(w, ((0, row_pad), (0, 0)))
        ws.append(w.astype(jnp.bfloat16))
        bs.append(b)
    b_packed = jnp.zeros((len(bs), MAX_WIDTH), jnp.float32)
    for i, b in enumerate(bs):
        b_packed = b_packed.at[i, : b.shape[0]].set(b)
    return (*ws, b_packed)


# ---------------------------------------------------------------------------
# Pure-JAX references.
# ---------------------------------------------------------------------------
def ref_kernel_numerics(x, kernel_params, action_size):
    """Mirrors the kernel's folded/padded/bf16 math exactly (tight check)."""
    *ws, b_packed = kernel_params
    h = x
    for i, w in enumerate(ws):
        width = w.shape[1]
        z = h.astype(jnp.bfloat16).astype(jnp.float32) @ w.astype(jnp.float32)
        z = z + b_packed[i, :width]
        h = jnp.maximum(z, 0.0)
    return h[:, :action_size]


def ref_original_f32(x, layers, bns):
    """Original unfused eval-mode QNetwork forward in f32 (loose check)."""
    h = x
    for i in range(4):
        w, b = layers[i]
        gamma, beta, rm, rv = bns[i]
        z = h @ w + b
        z = (z - rm) / jnp.sqrt(rv + BN_EPS) * gamma + beta
        h = jnp.maximum(z, 0.0)  # dropout after layer 1 is identity in eval
    w, b = layers[4]
    return jnp.maximum(h @ w + b, 0.0)


if __name__ == "__main__":
    state_size = 16
    action_size = 4

    key = jax.random.PRNGKey(0)
    layers, bns = init_raw_params(key, state_size, action_size)
    kernel_params = prepare_kernel_params(layers, bns)

    # --- Small batch: gridless path (typical RL stepping). ---
    key, kx = jax.random.split(key)
    x_small = jax.random.normal(kx, (8, state_size), jnp.float32)
    q_small = jax.block_until_ready(qnetwork_forward(x_small, kernel_params, action_size))
    assert q_small.shape == (8, action_size)
    assert jnp.allclose(
        q_small, ref_kernel_numerics(x_small, kernel_params, action_size),
        atol=1e-4, rtol=1e-4)
    assert jnp.allclose(
        q_small, ref_original_f32(x_small, layers, bns), atol=5e-2, rtol=5e-2)

    # --- Larger batch: grid path (batch-tiled, weights resident across tiles). ---
    key, kx = jax.random.split(key)
    x_big = jax.random.normal(kx, (300, state_size), jnp.float32)
    q_big = jax.block_until_ready(qnetwork_forward(x_big, kernel_params, action_size))
    assert q_big.shape == (300, action_size)
    assert jnp.allclose(
        q_big, ref_kernel_numerics(x_big, kernel_params, action_size),
        atol=1e-4, rtol=1e-4)
    assert jnp.allclose(
        q_big, ref_original_f32(x_big, layers, bns), atol=5e-2, rtol=5e-2)

    print("KERNEL_OK")
</pallas_src>

<mosaic_0001>
module attributes {stable_mosaic.version = 11 : i64} {
  func.func @qnetwork_kernel(%arg0: memref<8x16xf32, #tpu.memory_space<vmem>>, %arg1: memref<16x256xbf16, #tpu.memory_space<vmem>>, %arg2: memref<256x324xbf16, #tpu.memory_space<vmem>>, %arg3: memref<324x512xbf16, #tpu.memory_space<vmem>>, %arg4: memref<512x128xbf16, #tpu.memory_space<vmem>>, %arg5: memref<128x128xbf16, #tpu.memory_space<vmem>>, %arg6: memref<5x512xf32, #tpu.memory_space<vmem>>, %arg7: memref<8x128xf32, #tpu.memory_space<vmem>>) attributes {dimension_semantics = [], scalar_prefetch = 0 : i64, scratch_operands = 0 : i64, tpu.core_type = #tpu.core_type<tc>} {
    %c0 = arith.constant 0 : index
    %c0_0 = arith.constant 0 : index
    %0 = vector.load %arg0[%c0, %c0_0] : memref<8x16xf32, #tpu.memory_space<vmem>>, vector<8x16xf32>
    %1 = arith.truncf %0 : vector<8x16xf32> to vector<8x16xbf16>
    %c0_1 = arith.constant 0 : index
    %c0_2 = arith.constant 0 : index
    %2 = vector.load %arg1[%c0_1, %c0_2] : memref<16x256xbf16, #tpu.memory_space<vmem>>, vector<16x256xbf16>
    %cst = arith.constant dense<0.000000e+00> : vector<8x256xf32>
    %3 = tpu.matmul %1, %2, %cst {dimension_numbers = #tpu.dot_dimension_numbers<[1], [0], [0], [1], [0, 0, 1, 1], [], []>} : vector<8x16xbf16>, vector<16x256xbf16>, vector<8x256xf32> -> vector<8x256xf32>
    %c0_3 = arith.constant 0 : index
    %c0_4 = arith.constant 0 : index
    %4 = vector.load %arg6[%c0_3, %c0_4] : memref<5x512xf32, #tpu.memory_space<vmem>>, vector<1x256xf32>
    %5 = vector.broadcast %4 : vector<1x256xf32> to vector<8x256xf32>
    %6 = arith.addf %3, %5 : vector<8x256xf32>
    %cst_5 = arith.constant 0.000000e+00 : f32
    %7 = vector.broadcast %cst_5 : f32 to vector<8x256xf32>
    %8 = arith.maximumf %6, %7 : vector<8x256xf32>
    %9 = arith.truncf %8 : vector<8x256xf32> to vector<8x256xbf16>
    %c0_6 = arith.constant 0 : index
    %c0_7 = arith.constant 0 : index
    %10 = vector.load %arg2[%c0_6, %c0_7] : memref<256x324xbf16, #tpu.memory_space<vmem>>, vector<256x324xbf16>
    %cst_8 = arith.constant dense<0.000000e+00> : vector<8x324xf32>
    %11 = tpu.matmul %9, %10, %cst_8 {dimension_numbers = #tpu.dot_dimension_numbers<[1], [0], [0], [1], [0, 0, 1, 1], [], []>} : vector<8x256xbf16>, vector<256x324xbf16>, vector<8x324xf32> -> vector<8x324xf32>
    %c1 = arith.constant 1 : index
    %c0_9 = arith.constant 0 : index
    %12 = vector.load %arg6[%c1, %c0_9] : memref<5x512xf32, #tpu.memory_space<vmem>>, vector<1x324xf32>
    %13 = vector.broadcast %12 : vector<1x324xf32> to vector<8x324xf32>
    %14 = arith.addf %11, %13 : vector<8x324xf32>
    %cst_10 = arith.constant 0.000000e+00 : f32
    %15 = vector.broadcast %cst_10 : f32 to vector<8x324xf32>
    %16 = arith.maximumf %14, %15 : vector<8x324xf32>
    %17 = arith.truncf %16 : vector<8x324xf32> to vector<8x324xbf16>
    %c0_11 = arith.constant 0 : index
    %c0_12 = arith.constant 0 : index
    %18 = vector.load %arg3[%c0_11, %c0_12] : memref<324x512xbf16, #tpu.memory_space<vmem>>, vector<324x512xbf16>
    %cst_13 = arith.constant dense<0.000000e+00> : vector<8x512xf32>
    %19 = tpu.matmul %17, %18, %cst_13 {dimension_numbers = #tpu.dot_dimension_numbers<[1], [0], [0], [1], [0, 0, 1, 1], [], []>} : vector<8x324xbf16>, vector<324x512xbf16>, vector<8x512xf32> -> vector<8x512xf32>
    %c2 = arith.constant 2 : index
    %c0_14 = arith.constant 0 : index
    %20 = vector.load %arg6[%c2, %c0_14] : memref<5x512xf32, #tpu.memory_space<vmem>>, vector<1x512xf32>
    %21 = vector.broadcast %20 : vector<1x512xf32> to vector<8x512xf32>
    %22 = arith.addf %19, %21 : vector<8x512xf32>
    %cst_15 = arith.constant 0.000000e+00 : f32
    %23 = vector.broadcast %cst_15 : f32 to vector<8x512xf32>
    %24 = arith.maximumf %22, %23 : vector<8x512xf32>
    %25 = arith.truncf %24 : vector<8x512xf32> to vector<8x512xbf16>
    %c0_16 = arith.constant 0 : index
    %c0_17 = arith.constant 0 : index
    %26 = vector.load %arg4[%c0_16, %c0_17] : memref<512x128xbf16, #tpu.memory_space<vmem>>, vector<512x128xbf16>
    %cst_18 = arith.constant dense<0.000000e+00> : vector<8x128xf32>
    %27 = tpu.matmul %25, %26, %cst_18 {dimension_numbers = #tpu.dot_dimension_numbers<[1], [0], [0], [1], [0, 0, 1, 1], [], []>} : vector<8x512xbf16>, vector<512x128xbf16>, vector<8x128xf32> -> vector<8x128xf32>
    %c3 = arith.constant 3 : index
    %c0_19 = arith.constant 0 : index
    %28 = vector.load %arg6[%c3, %c0_19] : memref<5x512xf32, #tpu.memory_space<vmem>>, vector<1x128xf32>
    %29 = vector.broadcast %28 : vector<1x128xf32> to vector<8x128xf32>
    %30 = arith.addf %27, %29 : vector<8x128xf32>
    %cst_20 = arith.constant 0.000000e+00 : f32
    %31 = vector.broadcast %cst_20 : f32 to vector<8x128xf32>
    %32 = arith.maximumf %30, %31 : vector<8x128xf32>
    %33 = arith.truncf %32 : vector<8x128xf32> to vector<8x128xbf16>
    %c0_21 = arith.constant 0 : index
    %c0_22 = arith.constant 0 : index
    %34 = vector.load %arg5[%c0_21, %c0_22] : memref<128x128xbf16, #tpu.memory_space<vmem>>, vector<128x128xbf16>
    %cst_23 = arith.constant dense<0.000000e+00> : vector<8x128xf32>
    %35 = tpu.matmul %33, %34, %cst_23 {dimension_numbers = #tpu.dot_dimension_numbers<[1], [0], [0], [1], [0, 0, 1, 1], [], []>} : vector<8x128xbf16>, vector<128x128xbf16>, vector<8x128xf32> -> vector<8x128xf32>
    %c4 = arith.constant 4 : index
    %c0_24 = arith.constant 0 : index
    %36 = vector.load %arg6[%c4, %c0_24] : memref<5x512xf32, #tpu.memory_space<vmem>>, vector<1x128xf32>
    %37 = vector.broadcast %36 : vector<1x128xf32> to vector<8x128xf32>
    %38 = arith.addf %35, %37 : vector<8x128xf32>
    %cst_25 = arith.constant 0.000000e+00 : f32
    %39 = vector.broadcast %cst_25 : f32 to vector<8x128xf32>
    %40 = arith.maximumf %38, %39 : vector<8x128xf32>
    %c0_26 = arith.constant 0 : index
    %c0_27 = arith.constant 0 : index
    %41 = vector.load %arg7[%c0_26, %c0_27] : memref<8x128xf32, #tpu.memory_space<vmem>>, vector<8x128xf32>
    tpu.vector_store %arg7[%c0_26, %c0_27], %40 {strides = array<i32>} : memref<8x128xf32, #tpu.memory_space<vmem>>, vector<8x128xf32>,
    return
  }
}

</mosaic_0001>

<bundles_post_ra>
// kernel: tpu_custom_call.1
= control target key start
LH: loop header
LB: loop body
LE: loop exit
PB: predicated region body
PF: predicated region fallthrough
CT: control target
= control target key end

     0   :  { %12 = vsyncpa [#allocation3], 0  ;;  %s3459_s0 = inlined_call_operand.vmem [shape: f32[8,16], index: 0, kind: input, shape index: {}]   ;;  %s3460_s1 = inlined_call_operand.vmem [shape: bf16[16,256], index: 1, kind: input, shape index: {}]   ;;  %s3461_s2 = inlined_call_operand.vmem [shape: bf16[256,324], index: 2, kind: input, shape index: {}]   ;;  %s3462_s3 = inlined_call_operand.vmem [shape: bf16[324,512], index: 3, kind: input, shape index: {}]   ;;  %s3463_s4 = inlined_call_operand.hbm [shape: bf16[512,128], index: 4, kind: input, shape index: {}]   ;;  %s3464_s5 = inlined_call_operand.hbm [shape: bf16[128,128], index: 5, kind: input, shape index: {}]   ;;  %s3465_s6 = inlined_call_operand.vmem [shape: f32[5,512], index: 6, kind: input, shape index: {}]   ;;  %s3466_s7 = inlined_call_operand.hbm [shape: f32[8,128], index: 7, kind: output, shape index: {}]  }
   0x1   :  { %13 = vsyncpa [#allocation6], 0 }
   0x2   :  { %14 = vsyncpa [#allocation4], 0  ;;  %s27_s26 = sshll.u32 %s3463_s4, 4  ;;  %s2561_s27 = smov [#allocation2]   ;;  %s28_s26 = int_to_ptr.hbm [resolvable:$true] %s27_s26 }
   0x3   :  { %s29_s28 = sshll.u32 %s2561_s27, 4  ;;  %s40_s8 = sshll.u32 %s3464_s5, 4  ;;  %s30_s28 = int_to_ptr.vmem [resolvable:$true] %s29_s28  ;;  %s41_s8 = int_to_ptr.hbm [resolvable:$true] %s40_s8 }
   0x4   :  { %s2562_s9 = smov 64   ;;  %s2563_s10 = smov 4  }
   0x5   :  { %35 = dma.hbm_to_vmem [thread:$0]  %s28_s26, 4096, %s30_s28, [#allocation3], %s2562_s9, %s2562_s9, %s2563_s10  }
   0x6   :  { %s2564_s11 = smov [#allocation5]  }
   0x7   :  { %s42_s12 = sshll.u32 %s2564_s11, 4  ;;  %s43_s12 = int_to_ptr.vmem [resolvable:$true] %s42_s12 }
   0x8   :  { %48 = dma.hbm_to_vmem [thread:$0]  %s41_s8, 1024, %s43_s12, [#allocation6], %s2562_s9, %s2562_s9, %s2563_s10  }
   0x9   :  { %2555 = dma.done.wait [#allocation3], 4096  }
   0xa   :  { %2556 = vsyncadd [#allocation3], 4294963200 }
   0xb   :  { %2557 = dma.done.wait [#allocation6], 1024  }
   0xc   :  { %2558 = vsyncadd [#allocation6], 4294966272  ;;  %v1622_v0 = vld [vmem:[%s3460_s1] sm:$0xf]  ;;  %v2309_v1 = vld [vmem:[%s3460_s1 + $0x4] sm:$0xf0] }
   0xd   :  { %v2308_v2 = vld [vmem:[%s3460_s1 + $0x4] sm:$0xf]  ;;  %v1623_v3 = vor.u32 %v2309_v1, %v1622_v0  ;;  %v1624_v4 = vld [vmem:[%s3460_s1 + $0x8] sm:$0xf0]  ;;  %v1813_v6 = vld [vmem:[%s3461_s2 + $0x168] sm:$0xf] }
   0xe   :  { %v60_v5 = vld [vmem:[%s3459_s0] sm:$0xff]  ;;  %v1627_v7 = vor.u32 %v2308_v2, %v1624_v4  ;;  %v2356_v9 = vld [vmem:[%s3461_s2 + $0x170] sm:$0xf0]  ;;  %v1801_v10 = vld [vmem:[%s3461_s2 + $0x150] sm:$0xf]  ;;  %vm80_vm0 = vcmask 130048  }
   0xf   :  { %v61_v8 = vpack.c.bf16 %v60_v5, %v60_v5  ;;  %v2353_v11 = vld [vmem:[%s3461_s2 + $0x158] sm:$0xf0]  ;;  %91 = vmatpush.bf16.msra.mxu3 %v1623_v3  ;;  %v1814_v12 = vor.u32 %v2356_v9, %v1813_v6  ;;  %v1717_v13 = vld [vmem:[%s3461_s2 + $0xa8] sm:$0xf]  ;;  %v2332_v14 = vld [vmem:[%s3461_s2 + $0xb0] sm:$0xf0] }
  0x10   :  { %104 = vmatpush.bf16.msra.mxu0 %v1627_v7  ;;  %v1718_v15 = vor.u32 %v2332_v14, %v1717_v13  ;;  %v1705_v16 = vld [vmem:[%s3461_s2 + $0x90] sm:$0xf]  ;;  %v2329_v17 = vld [vmem:[%s3461_s2 + $0x98] sm:$0xf0]  ;;  %v1802_v18 = vor.u32 %v2353_v11, %v1801_v10  ;;  %v2355_v19 = vld [vmem:[%s3461_s2 + $0x16c] sm:$0xf] }
  0x11   :  { %v1789_v20 = vld [vmem:[%s3461_s2 + $0x138] sm:$0xf]  ;;  %v2350_v21 = vld [vmem:[%s3461_s2 + $0x140] sm:$0xf0]  ;;  %v1706_v22 = vor.u32 %v2329_v17, %v1705_v16  ;;  %v2352_v27 = vld [vmem:[%s3461_s2 + $0x154] sm:$0xf] }
  0x12   :  { %1628 = vmatmul.msk.bf16.vlgmr.msra.gmra.mxu3 %vm80_vm0, %v61_v8  ;;  %443 = vmatpush.bf16.msra.mxu2 %v1718_v15  ;;  %v1815_v23 = vld [vmem:[%s3461_s2 + $0x174] sm:$0xf0]  ;;  %v2326_v26 = vld [vmem:[%s3461_s2 + $0x80] sm:$0xf0]  ;;  %v1803_v28 = vld [vmem:[%s3461_s2 + $0x15c] sm:$0xf0]  ;;  %v1790_v29 = vor.u32 %v2350_v21, %v1789_v20 }
  0x13   :  { %456 = vmatpush.bf16.msrb.mxu3 %v1814_v12  ;;  %1629 = vmatmul.msk.bf16.vlgmr.msra.gmra.mxu0 %vm80_vm0, %v61_v8  ;;  %v1818_v24 = vor.u32 %v2355_v19, %v1815_v23  ;;  %v1693_v25 = vld [vmem:[%s3461_s2 + $0x78] sm:$0xf]  ;;  %v1777_v30 = vld [vmem:[%s3461_s2 + $0x120] sm:$0xf]  ;;  %v1806_v31 = vor.u32 %v2352_v27, %v1803_v28  ;;  %v2331_v32 = vld [vmem:[%s3461_s2 + $0xac] sm:$0xf] }
  0x14   :  { %v1719_v33 = vld [vmem:[%s3461_s2 + $0xb4] sm:$0xf0]  ;;  %v2347_v34 = vld [vmem:[%s3461_s2 + $0x128] sm:$0xf0]  ;;  %v1694_v35 = vor.u32 %v2326_v26, %v1693_v25  ;;  %v2349_v37 = vld [vmem:[%s3461_s2 + $0x13c] sm:$0xf] }
  0x15   :  { %482 = vmatpush.bf16.msra.mxu1 %v1818_v24  ;;  %v1722_v36 = vor.u32 %v2331_v32, %v1719_v33  ;;  %v1791_v38 = vld [vmem:[%s3461_s2 + $0x144] sm:$0xf0]  ;;  %v1681_v39 = vld [vmem:[%s3461_s2 + $0x60] sm:$0xf]  ;;  %v2323_v40 = vld [vmem:[%s3461_s2 + $0x68] sm:$0xf0]  ;;  %v1778_v43 = vor.u32 %v2347_v34, %v1777_v30 }
  0x16   :  { %444 = vmatpush.bf16.msra.mxu2 %v1706_v22  ;;  %v2328_v41 = vld [vmem:[%s3461_s2 + $0x94] sm:$0xf]  ;;  %v1707_v42 = vld [vmem:[%s3461_s2 + $0x9c] sm:$0xf0]  ;;  %v1765_v44 = vld [vmem:[%s3461_s2 + $0x108] sm:$0xf]  ;;  %v1794_v46 = vor.u32 %v2349_v37, %v1791_v38  ;;  %v1682_v49 = vor.u32 %v2323_v40, %v1681_v39 }
  0x17   :  { %457 = vmatpush.bf16.msrb.mxu3 %v1802_v18  ;;  %469 = vmatpush.bf16.msrb.mxu0 %v1722_v36  ;;  %v2344_v45 = vld [vmem:[%s3461_s2 + $0x110] sm:$0xf0]  ;;  %v1710_v47 = vor.u32 %v2328_v41, %v1707_v42  ;;  %v2346_v48 = vld [vmem:[%s3461_s2 + $0x124] sm:$0xf]  ;;  %v1779_v50 = vld [vmem:[%s3461_s2 + $0x12c] sm:$0xf0] }
  0x18   :  { %v2325_v51 = vld [vmem:[%s3461_s2 + $0x7c] sm:$0xf]  ;;  %v1695_v52 = vld [vmem:[%s3461_s2 + $0x84] sm:$0xf0]  ;;  %v2320_v54 = vld [vmem:[%s3461_s2 + $0x50] sm:$0xf0]  ;;  %v1766_v56 = vor.u32 %v2344_v45, %v1765_v44  ;;  %v1782_v59 = vor.u32 %v2346_v48, %v1779_v50 }
  0x19   :  { %483 = vmatpush.bf16.msra.mxu1 %v1806_v31  ;;  %v1669_v53 = vld [vmem:[%s3461_s2 + $0x48] sm:$0xf]  ;;  %v1698_v55 = vor.u32 %v2325_v51, %v1695_v52  ;;  %v1753_v57 = vld [vmem:[%s3461_s2 + $0xf0] sm:$0xf]  ;;  %v2341_v58 = vld [vmem:[%s3461_s2 + $0xf8] sm:$0xf0] }
  0x1a   :  { %445 = vmatpush.bf16.msra.mxu2 %v1694_v35  ;;  %v2322_v60 = vld [vmem:[%s3461_s2 + $0x64] sm:$0xf]  ;;  %v1670_v61 = vor.u32 %v2320_v54, %v1669_v53  ;;  %v2343_v62 = vld [vmem:[%s3461_s2 + $0x10c] sm:$0xf]  ;;  %v1767_v63 = vld [vmem:[%s3461_s2 + $0x114] sm:$0xf0]  ;;  %v1754_v4 = vor.u32 %v2341_v58, %v1753_v57 }
  0x1b   :  { %458 = vmatpush.bf16.msrb.mxu3 %v1790_v29  ;;  %470 = vmatpush.bf16.msrb.mxu0 %v1710_v47  ;;  %v1683_v0 = vld [vmem:[%s3461_s2 + $0x6c] sm:$0xf0]  ;;  %v2317_v2 = vld [vmem:[%s3461_s2 + $0x38] sm:$0xf0]  ;;  %v1741_v5 = vld [vmem:[%s3461_s2 + $0xd8] sm:$0xf]  ;;  %v1770_v6 = vor.u32 %v2343_v62, %v1767_v63 }
  0x1c   :  { %v1657_v1 = vld [vmem:[%s3461_s2 + $0x30] sm:$0xf]  ;;  %v1686_v3 = vor.u32 %v2322_v60, %v1683_v0  ;;  %v2319_v7 = vld [vmem:[%s3461_s2 + $0x4c] sm:$0xf]  ;;  %v1671_v8 = vld [vmem:[%s3461_s2 + $0x54] sm:$0xf0] }
  0x1d   :  { %484 = vmatpush.bf16.msra.mxu1 %v1794_v46  ;;  %v2338_v9 = vld [vmem:[%s3461_s2 + $0xe0] sm:$0xf0]  ;;  %v1658_v10 = vor.u32 %v2317_v2, %v1657_v1  ;;  %v2340_v11 = vld [vmem:[%s3461_s2 + $0xf4] sm:$0xf]  ;;  %v1755_v12 = vld [vmem:[%s3461_s2 + $0xfc] sm:$0xf0]  ;;  %v1674_v15 = vor.u32 %v2319_v7, %v1671_v8 }
  0x1e   :  { %446 = vmatpush.bf16.msra.mxu2 %v1682_v49  ;;  %v1645_v13 = vld [vmem:[%s3461_s2 + $0x18] sm:$0xf]  ;;  %v2314_v14 = vld [vmem:[%s3461_s2 + $0x20] sm:$0xf0]  ;;  %v1742_v16 = vor.u32 %v2338_v9, %v1741_v5  ;;  %v1758_v17 = vor.u32 %v2340_v11, %v1755_v12  ;;  %v1729_v18 = vld [vmem:[%s3461_s2 + $0xc0] sm:$0xf] }
  0x1f   :  { %459 = vmatpush.bf16.msrb.mxu3 %v1778_v43  ;;  %471 = vmatpush.bf16.msrb.mxu0 %v1698_v55  ;;  %v2335_v19 = vld [vmem:[%s3461_s2 + $0xc8] sm:$0xf0]  ;;  %v1821_v20 = vld [vmem:[%s3461_s2 + $0x170] sm:$0xf]  ;;  %v1646_v21 = vor.u32 %v2314_v14, %v1645_v13  ;;  %v2357_v22 = vld [vmem:[%s3461_s2 + $0x178] sm:$0xf0] }
  0x20   :  { %v1633_v23 = vld [vmem:[%s3461_s2] sm:$0xf]  ;;  %v2311_v24 = vld [vmem:[%s3461_s2 + $0x8] sm:$0xf0]  ;;  %v1725_v25 = vld [vmem:[%s3461_s2 + $0xb0] sm:$0xf]  ;;  %v1730_v27 = vor.u32 %v2335_v19, %v1729_v18  ;;  %v1822_v28 = vor.u32 %v2357_v22, %v1821_v20 }
  0x21   :  { %485 = vmatpush.bf16.msra.mxu1 %v1782_v59  ;;  %v2333_v26 = vld [vmem:[%s3461_s2 + $0xb8] sm:$0xf0]  ;;  %v1634_v29 = vor.u32 %v2311_v24, %v1633_v23  ;;  %v1809_v30 = vld [vmem:[%s3461_s2 + $0x158] sm:$0xf]  ;;  %v2354_v31 = vld [vmem:[%s3461_s2 + $0x160] sm:$0xf0] }
  0x22   :  { %447 = vmatpush.bf16.msra.mxu2 %v1670_v61  ;;  %v1726_v32 = vor.u32 %v2333_v26, %v1725_v25  ;;  %v1810_v33 = vor.u32 %v2354_v31, %v1809_v30  ;;  %v2337_v34 = vld [vmem:[%s3461_s2 + $0xdc] sm:$0xf]  ;;  %v1743_v35 = vld [vmem:[%s3461_s2 + $0xe4] sm:$0xf0]  ;;  %v1797_v36 = vld [vmem:[%s3461_s2 + $0x140] sm:$0xf] }
  0x23   :  { %460 = vmatpush.bf16.msrb.mxu3 %v1766_v56  ;;  %472 = vmatpush.bf16.msrb.mxu0 %v1686_v3  ;;  %v1746_v37 = vor.u32 %v2337_v34, %v1743_v35  ;;  %v2351_v38 = vld [vmem:[%s3461_s2 + $0x148] sm:$0xf0]  ;;  %v2316_v40 = vld [vmem:[%s3461_s2 + $0x34] sm:$0xf]  ;;  %v1659_v41 = vld [vmem:[%s3461_s2 + $0x3c] sm:$0xf0] }
  0x24   :  { %v1798_v39 = vor.u32 %v2351_v38, %v1797_v36  ;;  %v1713_v42 = vld [vmem:[%s3461_s2 + $0x98] sm:$0xf]  ;;  %v1662_v43 = vor.u32 %v2316_v40, %v1659_v41  ;;  %v2330_v44 = vld [vmem:[%s3461_s2 + $0xa0] sm:$0xf0]  ;;  %v1731_v47 = vld [vmem:[%s3461_s2 + $0xcc] sm:$0xf0] }
  0x25   :  { %486 = vmatpush.bf16.msra.mxu1 %v1770_v6  ;;  %v1714_v45 = vor.u32 %v2330_v44, %v1713_v42  ;;  %v2334_v46 = vld [vmem:[%s3461_s2 + $0xc4] sm:$0xf]  ;;  %v1785_v48 = vld [vmem:[%s3461_s2 + $0x128] sm:$0xf]  ;;  %v2348_v50 = vld [vmem:[%s3461_s2 + $0x130] sm:$0xf0] }
  0x26   :  { %448 = vmatpush.bf16.msra.mxu2 %v1658_v10  ;;  %v1734_v49 = vor.u32 %v2334_v46, %v1731_v47  ;;  %v1786_v51 = vor.u32 %v2348_v50, %v1785_v48  ;;  %v2313_v52 = vld [vmem:[%s3461_s2 + $0x1c] sm:$0xf]  ;;  %v1647_v53 = vld [vmem:[%s3461_s2 + $0x24] sm:$0xf0]  ;;  %v1701_v54 = vld [vmem:[%s3461_s2 + $0x80] sm:$0xf] }
  0x27   :  { %461 = vmatpush.bf16.msrb.mxu3 %v1754_v4  ;;  %473 = vmatpush.bf16.msrb.mxu0 %v1674_v15  ;;  %v1650_v55 = vor.u32 %v2313_v52, %v1647_v53  ;;  %v2327_v56 = vld [vmem:[%s3461_s2 + $0x88] sm:$0xf0]  ;;  %v1773_v58 = vld [vmem:[%s3461_s2 + $0x110] sm:$0xf]  ;;  %v2345_v59 = vld [vmem:[%s3461_s2 + $0x118] sm:$0xf0] }
  0x28   :  { %v1702_v57 = vor.u32 %v2327_v56, %v1701_v54  ;;  %v1774_v60 = vor.u32 %v2345_v59, %v1773_v58  ;;  %v2310_v61 = vld [vmem:[%s3461_s2 + $0x4] sm:$0xf]  ;;  %v1635_v62 = vld [vmem:[%s3461_s2 + $0xc] sm:$0xf0]  ;;  %v1689_v63 = vld [vmem:[%s3461_s2 + $0x68] sm:$0xf] }
  0x29   :  { %487 = vmatpush.bf16.msra.mxu1 %v1758_v17  ;;  %v1638_v0 = vor.u32 %v2310_v61, %v1635_v62  ;;  %v2324_v1 = vld [vmem:[%s3461_s2 + $0x70] sm:$0xf0]  ;;  %v1761_v3 = vld [vmem:[%s3461_s2 + $0xf8] sm:$0xf]  ;;  %v2342_v4 = vld [vmem:[%s3461_s2 + $0x100] sm:$0xf0] }
  0x2a   :  { %449 = vmatpush.bf16.msra.mxu2 %v1646_v21  ;;  %v1690_v2 = vor.u32 %v2324_v1, %v1689_v63  ;;  %v1762_v5 = vor.u32 %v2342_v4, %v1761_v3  ;;  %v1677_v6 = vld [vmem:[%s3461_s2 + $0x50] sm:$0xf]  ;;  %v2321_v7 = vld [vmem:[%s3461_s2 + $0x58] sm:$0xf0]  ;;  %v1749_v9 = vld [vmem:[%s3461_s2 + $0xe0] sm:$0xf] }
  0x2b   :  { %462 = vmatpush.bf16.msrb.mxu3 %v1742_v16  ;;  %474 = vmatpush.bf16.msrb.mxu0 %v1662_v43  ;;  %v1678_v8 = vor.u32 %v2321_v7, %v1677_v6  ;;  %v2339_v10 = vld [vmem:[%s3461_s2 + $0xe8] sm:$0xf0]  ;;  %v1665_v11 = vld [vmem:[%s3461_s2 + $0x38] sm:$0xf]  ;;  %v2318_v13 = vld [vmem:[%s3461_s2 + $0x40] sm:$0xf0] }
  0x2c   :  { %v1750_v12 = vor.u32 %v2339_v10, %v1749_v9  ;;  %v1737_v14 = vld [vmem:[%s3461_s2 + $0xc8] sm:$0xf]  ;;  %v2336_v15 = vld [vmem:[%s3461_s2 + $0xd0] sm:$0xf0]  ;;  %v1666_v16 = vor.u32 %v2318_v13, %v1665_v11  ;;  %v1653_v17 = vld [vmem:[%s3461_s2 + $0x20] sm:$0xf] }
  0x2d   :  { %488 = vmatpush.bf16.msra.mxu1 %v1746_v37  ;;  %v2315_v18 = vld [vmem:[%s3461_s2 + $0x28] sm:$0xf0]  ;;  %v1738_v19 = vor.u32 %v2336_v15, %v1737_v14  ;;  %v1641_v21 = vld [vmem:[%s3461_s2 + $0x8] sm:$0xf]  ;;  %v2312_v22 = vld [vmem:[%s3461_s2 + $0x10] sm:$0xf0] }
  0x2e   :  { %450 = vmatpush.bf16.msra.mxu2 %v1634_v29  ;;  %v1654_v20 = vor.u32 %v2315_v18, %v1653_v17  ;;  %v1642_v23 = vor.u32 %v2312_v22, %v1641_v21  ;;  %v64_v24 = vld [vmem:[%s3465_s6] ss:$8 sm:$0x3]  ;;  %v2388_v26 = vld [vmem:[%s3462_s3 + $0xec] sm:$0xf0]  ;;  %vm1034_vm1 = vcmask 1041408  }
  0x2f   :  { %463 = vmatpush.bf16.msrb.mxu3 %v1730_v27  ;;  %475 = vmatpush.bf16.msrb.mxu0 %v1650_v55  ;;  %v1938_v25 = vld [vmem:[%s3462_s3 + $0xe0] sm:$0xf]  ;;  %v2384_v30 = vld [vmem:[%s3462_s3 + $0xcc] sm:$0xf0]  ;;  %v66_v41 = vperm.slane %v64_v24, 0  ;;  %vm1030_vm2 = vcmask 556032  }
  0x30   :  { %v1922_v27 = vld [vmem:[%s3462_s3 + $0xc0] sm:$0xf]  ;;  %v1939_v29 = vor.u32 %v2388_v26, %v1938_v25  ;;  %v2416_v37 = vld [vmem:[%s3462_s3 + $0x1cc] sm:$0xf0]  ;;  %v2386_v46 = vld [vmem:[%s3462_s3 + $0xe4] sm:$0xf] }
  0x31   :  { %489 = vmatpush.bf16.msra.mxu1 %v1734_v49  ;;  %v2066_v31 = vld [vmem:[%s3462_s3 + $0x1e0] sm:$0xf]  ;;  %v2380_v40 = vld [vmem:[%s3462_s3 + $0xac] sm:$0xf0]  ;;  %v1940_v48 = vld [vmem:[%s3462_s3 + $0xf0] sm:$0xf0] }
  0x32   :  { %495 = vmatpush.bf16.msrb.mxu2 %v1726_v32  ;;  %v1923_v32 = vor.u32 %v2384_v30, %v1922_v27  ;;  %v2050_v36 = vld [vmem:[%s3462_s3 + $0x1c0] sm:$0xf]  ;;  %v1943_v52 = vor.u32 %v2386_v46, %v1940_v48  ;;  %v2376_v55 = vld [vmem:[%s3462_s3 + $0x8c] sm:$0xf0]  ;;  %v1924_v61 = vld [vmem:[%s3462_s3 + $0xd0] sm:$0xf0] }
  0x33   :  { %508 = vmatpush.bf16.msra.mxu3 %v1822_v28  ;;  %476 = vmatpush.bf16.msrb.mxu0 %v1638_v0  ;;  %v67_v28 = vperm.slane %v64_v24, 1  ;;  %v2051_v42 = vor.u32 %v2416_v37, %v2050_v36  ;;  %v2034_v43 = vld [vmem:[%s3462_s3 + $0x1a0] sm:$0xf]  ;;  %v2408_v58 = vld [vmem:[%s3462_s3 + $0x18c] sm:$0xf0]  ;;  %s2565_s21 = smov [#allocation7]  }
  0x34   :  { %v2970_v53 = vld [vmem:[%s3462_s3 + $0x280] sm:$0x33]  ;;  %v2372_v3 = vld [vmem:[%s3462_s3 + $0x6c] sm:$0xf0]  ;;  %v1908_v13 = vld [vmem:[%s3462_s3 + $0xb0] sm:$0xf0] }
  0x35   :  { %v862_v59 = vunpack.c.l.b16 %v2970_v53  ;;  %v2002_v4 = vld [vmem:[%s3462_s3 + $0x160] sm:$0xf]  ;;  %v2436_v10 = vld [vmem:[%s3462_s3 + $0x26c] sm:$0xf0]  ;;  %v2418_v30 = vld [vmem:[%s3462_s3 + $0x1e4] sm:$0xf] }
  0x36   :  { %496 = vmatpush.bf16.msrb.mxu2 %v1714_v45  ;;  %v2412_v45 = vld [vmem:[%s3462_s3 + $0x1ac] sm:$0xf0]  ;;  %v2130_v9 = vld [vmem:[%s3462_s3 + $0x260] sm:$0xf]  ;;  %v2410_v46 = vld [vmem:[%s3462_s3 + $0x1a4] sm:$0xf] }
  0x37   :  { %509 = vmatpush.bf16.msra.mxu3 %v1810_v33  ;;  %1047 = vmatpush.bf16.msra.mxu0 %v1939_v29  ;;  %v2420_v33 = vld [vmem:[%s3462_s3 + $0x1ec] sm:$0xf0]  ;;  %v2035_v56 = vor.u32 %v2412_v45, %v2034_v43  ;;  %v946_v0 = vpack.c.b16 %v862_v59, %v862_v59  ;;  %v1858_v17 = vld [vmem:[%s3462_s3 + $0x40] sm:$0xf]  ;;  %v1892_v43 = vld [vmem:[%s3462_s3 + $0x90] sm:$0xf0] }
  0x38   :  { %v2067_v35 = vor.u32 %v2420_v33, %v2066_v31  ;;  %v2404_v11 = vld [vmem:[%s3462_s3 + $0x16c] sm:$0xf0]  ;;  %v1986_v21 = vld [vmem:[%s3462_s3 + $0x140] sm:$0xf]  ;;  %v2068_v31 = vld [vmem:[%s3462_s3 + $0x1f0] sm:$0xf0] }
  0x39   :  { %v1036_v7 = vsel %vm1034_vm1, %v946_v0, 0  ;;  %v2368_v18 = vld [vmem:[%s3462_s3 + $0x4c] sm:$0xf0]  ;;  %v1842_v24 = vld [vmem:[%s3462_s3 + $0x20] sm:$0xf]  ;;  %v2071_v33 = vor.u32 %v2418_v30, %v2068_v31  ;;  %s1607_s22 = sshll.u32 %s2565_s21, 4  ;;  %s1608_s22 = int_to_ptr.vmem [resolvable:$true] %s1607_s22 }
  0x3a   :  { %497 = vmatpush.bf16.msrb.mxu2 %v1702_v57  ;;  %1060 = vmatpush.bf16.msrb.mxu1 %v2067_v35  ;;  %v2018_v57 = vld [vmem:[%s3462_s3 + $0x180] sm:$0xf]  ;;  %v2400_v22 = vld [vmem:[%s3462_s3 + $0x14c] sm:$0xf0]  ;;  %v2052_v35 = vld [vmem:[%s3462_s3 + $0x1d0] sm:$0xf0] }
  0x3b   :  { %510 = vmatpush.bf16.msra.mxu3 %v1798_v39  ;;  %v1906_v39 = vld [vmem:[%s3462_s3 + $0xa0] sm:$0xf]  ;;  %1048 = vmatpush.bf16.msra.mxu0 %v1923_v32  ;;  %v2019_v6 = vor.u32 %v2408_v58, %v2018_v57  ;;  %v2364_v25 = vld [vmem:[%s3462_s3 + $0x2c] sm:$0xf0]  ;;  %v1987_v26 = vor.u32 %v2400_v22, %v1986_v21  ;;  %v1876_v57 = vld [vmem:[%s3462_s3 + $0x70] sm:$0xf0] }
  0x3c   :  { %v1907_v47 = vor.u32 %v2380_v40, %v1906_v39  ;;  %v1843_v27 = vor.u32 %v2364_v25, %v1842_v24  ;;  %v2360_v29 = vld [vmem:[%s3462_s3 + $0xc] sm:$0xf0]  ;;  %v1970_v37 = vld [vmem:[%s3462_s3 + $0x120] sm:$0xf]  ;;  %v2116_v22 = vld [vmem:[%s3462_s3 + $0x250] sm:$0xf0] }
  0x3d   :  { %v2114_v39 = vld [vmem:[%s3462_s3 + $0x240] sm:$0xf]  ;;  %v2385_v25 = vld [vmem:[%s3462_s3 + $0xd4] sm:$0xf0]  ;;  %s1609_s25 = sshll.u32 %s3466_s7, 4  ;;  %s1610_s25 = int_to_ptr.hbm [resolvable:$true] %s1609_s25 }
  0x3e   :  { %498 = vmatpush.bf16.msrb.mxu2 %v1690_v2  ;;  %1061 = vmatpush.bf16.msrb.mxu1 %v2051_v42  ;;  %v1874_v2 = vld [vmem:[%s3462_s3 + $0x60] sm:$0xf]  ;;  %v2374_v42 = vld [vmem:[%s3462_s3 + $0x84] sm:$0xf] }
  0x3f   :  { %511 = vmatpush.bf16.msra.mxu3 %v1786_v51  ;;  %v1890_v51 = vld [vmem:[%s3462_s3 + $0x80] sm:$0xf]  ;;  %1049 = vmatpush.bf16.msra.mxu0 %v1907_v47  ;;  %v1875_v15 = vor.u32 %v2372_v3, %v1874_v2  ;;  %v1895_v45 = vor.u32 %v2374_v42, %v1892_v43  ;;  %v2036_v47 = vld [vmem:[%s3462_s3 + $0x1b0] sm:$0xf0]  ;;  %v2366_v3 = vld [vmem:[%s3462_s3 + $0x44] sm:$0xf] }
  0x40   :  { %v1891_v1 = vor.u32 %v2376_v55, %v1890_v51  ;;  %v2039_v48 = vor.u32 %v2410_v46, %v2036_v47  ;;  %v2098_v51 = vld [vmem:[%s3462_s3 + $0x220] sm:$0xf]  ;;  %v2428_v55 = vld [vmem:[%s3462_s3 + $0x22c] sm:$0xf0]  ;;  %v2390_v43 = vld [vmem:[%s3462_s3 + $0x104] sm:$0xf] }
  0x41   :  { %v2099_v58 = vor.u32 %v2428_v55, %v2098_v51  ;;  %v2082_v0 = vld [vmem:[%s3462_s3 + $0x200] sm:$0xf]  ;;  %v2084_v47 = vld [vmem:[%s3462_s3 + $0x210] sm:$0xf0] }
  0x42   :  { %499 = vmatpush.bf16.msrb.mxu2 %v1678_v8  ;;  %1062 = vmatpush.bf16.msrb.mxu1 %v2035_v56  ;;  %v2370_v56 = vld [vmem:[%s3462_s3 + $0x64] sm:$0xf] }
  0x43   :  { %512 = vmatpush.bf16.msra.mxu3 %v1774_v60  ;;  %v2382_v60 = vld [vmem:[%s3462_s3 + $0xc4] sm:$0xf]  ;;  %1050 = vmatpush.bf16.msra.mxu0 %v1891_v1  ;;  %v1879_v59 = vor.u32 %v2370_v56, %v1876_v57  ;;  %v2424_v1 = vld [vmem:[%s3462_s3 + $0x20c] sm:$0xf0]  ;;  %v1882_v56 = vld [vmem:[%s3462_s3 + $0x68] sm:$0xf] }
  0x44   :  { %v1927_v8 = vor.u32 %v2382_v60, %v1924_v61  ;;  %v2020_v60 = vld [vmem:[%s3462_s3 + $0x190] sm:$0xf0]  ;;  %v2083_v2 = vor.u32 %v2424_v1, %v2082_v0  ;;  %v2373_v57 = vld [vmem:[%s3462_s3 + $0x74] sm:$0xf0] }
  0x45   :  { %v2429_v1 = vld [vmem:[%s3462_s3 + $0x234] sm:$0xf0] }
  0x46   :  { %500 = vmatpush.bf16.msrb.mxu2 %v1666_v16  ;;  %v2131_v16 = vor.u32 %v2436_v10, %v2130_v9  ;;  %1063 = vmatpush.bf16.msrb.mxu1 %v2019_v6  ;;  %v2132_v9 = vld [vmem:[%s3462_s3 + $0x270] sm:$0xf0] }
  0x47   :  { %513 = vmatpush.bf16.msra.mxu3 %v1762_v5  ;;  %1051 = vmatpush.bf16.msra.mxu0 %v1875_v15  ;;  %v2362_v15 = vld [vmem:[%s3462_s3 + $0x24] sm:$0xf] }
  0x4a   :  { %501 = vmatpush.bf16.msrb.mxu2 %v1654_v20 }
  0x4b   :  { %514 = vmatpush.bf16.msra.mxu3 %v1750_v12  ;;  %v2378_v12 = vld [vmem:[%s3462_s3 + $0xa4] sm:$0xf] }
  0x4c   :  { %v1911_v20 = vor.u32 %v2378_v12, %v1908_v13  ;;  %v1946_v12 = vld [vmem:[%s3462_s3 + $0xe8] sm:$0xf]  ;;  %v2389_v13 = vld [vmem:[%s3462_s3 + $0xf4] sm:$0xf0] }
  0x4e   :  { %502 = vmatpush.bf16.msrb.mxu2 %v1642_v23  ;;  %v1859_v23 = vor.u32 %v2368_v18, %v1858_v17  ;;  %v2398_v18 = vld [vmem:[%s3462_s3 + $0x144] sm:$0xf] }
  0x4f   :  { %515 = vmatpush.bf16.msra.mxu3 %v1738_v19  ;;  %v2003_v19 = vor.u32 %v2404_v11, %v2002_v4  ;;  %v1860_v4 = vld [vmem:[%s3462_s3 + $0x50] sm:$0xf0] }
  0x50   :  { %1052 = vmatpush.bf16.msra.mxu0 %v1859_v23  ;;  %v1863_v6 = vor.u32 %v2366_v3, %v1860_v4  ;;  %v1930_v23 = vld [vmem:[%s3462_s3 + $0xc8] sm:$0xf]  ;;  %v2365_v4 = vld [vmem:[%s3462_s3 + $0x34] sm:$0xf0] }
  0x51   :  { %1064 = vmatpush.bf16.msrb.mxu1 %v2003_v19  ;;  %v1988_v19 = vld [vmem:[%s3462_s3 + $0x150] sm:$0xf0]  ;;  %v1850_v3 = vld [vmem:[%s3462_s3 + $0x28] sm:$0xf] }
  0x52   :  { %v1991_v21 = vor.u32 %v2398_v18, %v1988_v19 }
  0x54   :  { %1053 = vmatpush.bf16.msra.mxu0 %v1843_v27  ;;  %v1931_v27 = vor.u32 %v2385_v25, %v1930_v23 }
  0x55   :  { %1065 = vmatpush.bf16.msrb.mxu1 %v1987_v26  ;;  %v3159_v26 = vld [vmem:[%s3462_s3 + $0x288] sm:$0x33] }
  0x56   :  { %v864_v30 = vunpack.c.l.b16 %v3159_v26 }
  0x90   :  { %v106_v34 = vpop.f32.mrf.mxu0 }
  0x91   :  { %v107_v38 = vadd.f32 %v106_v34, %v67_v28  ;;  %v1826_v28 = vld [vmem:[%s3462_s3] sm:$0xf]  ;;  %v2414_v34 = vld [vmem:[%s3462_s3 + $0x1c4] sm:$0xf] }
  0x92   :  { %v1827_v32 = vor.u32 %v2360_v29, %v1826_v28  ;;  %v2055_v36 = vor.u32 %v2414_v34, %v2052_v35  ;;  %v2358_v28 = vld [vmem:[%s3462_s3 + $0x4] sm:$0xf]  ;;  %v1828_v29 = vld [vmem:[%s3462_s3 + $0x10] sm:$0xf0] }
  0x93   :  { %v111_v44 = vmax.f32 %v107_v38, 0.0  ;;  %v2396_v38 = vld [vmem:[%s3462_s3 + $0x12c] sm:$0xf0]  ;;  %v1831_v31 = vor.u32 %v2358_v28, %v1828_v29  ;;  %v2426_v34 = vld [vmem:[%s3462_s3 + $0x224] sm:$0xf] }
  0x94   :  { %1054 = vmatpush.bf16.msra.mxu0 %v1827_v32  ;;  %v1971_v40 = vor.u32 %v2396_v38, %v1970_v37  ;;  %v2394_v32 = vld [vmem:[%s3462_s3 + $0x124] sm:$0xf]  ;;  %v1914_v37 = vld [vmem:[%s3462_s3 + $0xa8] sm:$0xf]  ;;  %v2381_v38 = vld [vmem:[%s3462_s3 + $0xb4] sm:$0xf0] }
  0x95   :  { %v2962_v49 = vpack.c.bf16 %v111_v44, %v111_v44  ;;  %v93_v50 = vpop.f32.mrf.mxu3 }
  0x96   :  { %v94_v54 = vadd.f32 %v93_v50, %v66_v41  ;;  %v2432_v41 = vld [vmem:[%s3462_s3 + $0x24c] sm:$0xf0]  ;;  %1066 = vmatpush.bf16.msrb.mxu1 %v1971_v40 }
  0x97   :  { %464 = vmatmul.bf16.vlgmr.msrb.gmra.mxu3 %v2962_v49  ;;  %490 = vmatmul.bf16.vlgmr.msra.gmra.mxu1 %v2962_v49  ;;  %v2115_v44 = vor.u32 %v2432_v41, %v2114_v39  ;;  %v2392_v50 = vld [vmem:[%s3462_s3 + $0x10c] sm:$0xf0]  ;;  %v948_v39 = vpack.c.b16 %v864_v30, %v864_v30  ;;  %v1915_v41 = vor.u32 %v2381_v38, %v1914_v37  ;;  %v2058_v30 = vld [vmem:[%s3462_s3 + $0x1c8] sm:$0xf] }
  0x98   :  { %v110_v62 = vmax.f32 %v94_v54, 0.0  ;;  %v108_v63 = vpop.f32.mrf.mxu0  ;;  %1086 = vmatpush.bf16.msrb.mxu3 %v1943_v52  ;;  %v863_v52 = vunpack.c.h.b16 %v2970_v53  ;;  %v2406_v53 = vld [vmem:[%s3462_s3 + $0x184] sm:$0xf] }
  0x99   :  { %v1042_v42 = vsel %vm1034_vm1, %v948_v39, 0  ;;  %v2042_v39 = vld [vmem:[%s3462_s3 + $0x1a8] sm:$0xf] }
  0x9a   :  { %v112_v5 = vpack.c.bf16 %v110_v62, %v110_v62  ;;  %v947_v61 = vpack.c.b16 %v863_v52, %v863_v52  ;;  %v2023_v62 = vor.u32 %v2406_v53, %v2020_v60  ;;  %v2138_v52 = vld [vmem:[%s3462_s3 + $0x268] sm:$0xf]  ;;  %v2433_v53 = vld [vmem:[%s3462_s3 + $0x254] sm:$0xf0] }
  0x9c   :  { %451 = vmatmul.bf16.vlgmr.msra.gmra.mxu2 %v112_v5  ;;  %477 = vmatmul.bf16.vlgmr.msrb.gmra.mxu0 %v112_v5  ;;  %v1039_v63 = vsel %vm1034_vm1, %v947_v61, 0  ;;  %v1866_v61 = vld [vmem:[%s3462_s3 + $0x48] sm:$0xf] }
  0x9d   :  { %v95_v14 = vpop.f32.mrf.mxu3  ;;  %1076 = vmatpush.bf16.msra.mxu2 %v1036_v7  ;;  %1087 = vmatpush.bf16.msrb.mxu3 %v1927_v8  ;;  %v2004_v7 = vld [vmem:[%s3462_s3 + $0x170] sm:$0xf0]  ;;  %v2434_v8 = vld [vmem:[%s3462_s3 + $0x264] sm:$0xf] }
  0x9e   :  { %1099 = vmatpush.bf16.msrb.mxu0 %v2071_v33  ;;  %v2135_v11 = vor.u32 %v2434_v8, %v2132_v9  ;;  %v1947_v14 = vor.u32 %v2389_v13, %v1946_v12  ;;  %v1972_v33 = vld [vmem:[%s3462_s3 + $0x130] sm:$0xf0]  ;;  %v2425_v8 = vld [vmem:[%s3462_s3 + $0x214] sm:$0xf0]  ;;  %v1834_v12 = vld [vmem:[%s3462_s3 + $0x8] sm:$0xf] }
  0x9f   :  { %v1975_v35 = vor.u32 %v2394_v32, %v1972_v33  ;;  %v2361_v13 = vld [vmem:[%s3462_s3 + $0x14] sm:$0xf0] }
  0xa1   :  { %1077 = vmatpush.bf16.msra.mxu2 %v2131_v16  ;;  %1088 = vmatpush.bf16.msrb.mxu3 %v1911_v20  ;;  %v1844_v16 = vld [vmem:[%s3462_s3 + $0x30] sm:$0xf0]  ;;  %v2430_v20 = vld [vmem:[%s3462_s3 + $0x244] sm:$0xf] }
  0xa2   :  { %1100 = vmatpush.bf16.msrb.mxu0 %v2055_v36  ;;  %v1847_v17 = vor.u32 %v2362_v15, %v1844_v16  ;;  %v2119_v24 = vor.u32 %v2430_v20, %v2116_v22  ;;  %v2100_v36 = vld [vmem:[%s3462_s3 + $0x230] sm:$0xf0]  ;;  %v2421_v22 = vld [vmem:[%s3462_s3 + $0x1f4] sm:$0xf0] }
  0xa3   :  { %v2103_v40 = vor.u32 %v2426_v34, %v2100_v36 }
  0xa5   :  { %1078 = vmatpush.bf16.msra.mxu2 %v2115_v44  ;;  %1089 = vmatpush.bf16.msrb.mxu3 %v1895_v45  ;;  %v1956_v44 = vld [vmem:[%s3462_s3 + $0x110] sm:$0xf0]  ;;  %v2422_v45 = vld [vmem:[%s3462_s3 + $0x204] sm:$0xf] }
  0xa6   :  { %1101 = vmatpush.bf16.msrb.mxu0 %v2039_v48  ;;  %v1959_v46 = vor.u32 %v2390_v43, %v1956_v44  ;;  %v1898_v48 = vld [vmem:[%s3462_s3 + $0x88] sm:$0xf]  ;;  %v1932_v43 = vld [vmem:[%s3462_s3 + $0xd8] sm:$0xf0] }
  0xa7   :  { %516 = vmatmul.bf16.vlgmr.msra.gmra.mxu3 %v2962_v49  ;;  %v1954_v49 = vld [vmem:[%s3462_s3 + $0x100] sm:$0xf] }
  0xa8   :  { %v1955_v54 = vor.u32 %v2392_v50, %v1954_v49  ;;  %v2377_v49 = vld [vmem:[%s3462_s3 + $0x94] sm:$0xf0]  ;;  %v2087_v50 = vor.u32 %v2422_v45, %v2084_v47  ;;  %v2140_v47 = vld [vmem:[%s3462_s3 + $0x278] sm:$0xf0] }
  0xa9   :  { %1079 = vmatpush.bf16.msra.mxu2 %v2099_v58  ;;  %1090 = vmatpush.bf16.msrb.mxu3 %v1879_v59  ;;  %v1899_v51 = vor.u32 %v2377_v49, %v1898_v48  ;;  %v2122_v58 = vld [vmem:[%s3462_s3 + $0x248] sm:$0xf]  ;;  %v1883_v59 = vor.u32 %v2373_v57, %v1882_v56  ;;  %v1916_v57 = vld [vmem:[%s3462_s3 + $0xb8] sm:$0xf0] }
  0xaa   :  { %1067 = vmatpush.bf16.msrb.mxu1 %v1955_v54  ;;  %1102 = vmatpush.bf16.msrb.mxu0 %v2023_v62  ;;  %v2437_v54 = vld [vmem:[%s3462_s3 + $0x274] sm:$0xf0]  ;;  %v2123_v60 = vor.u32 %v2433_v53, %v2122_v58  ;;  %v2431_v58 = vld [vmem:[%s3462_s3 + $0x24c] sm:$0xf] }
  0xab   :  { %v2139_v55 = vor.u32 %v2437_v54, %v2138_v52  ;;  %v2369_v62 = vld [vmem:[%s3462_s3 + $0x54] sm:$0xf0]  ;;  %v2379_v54 = vld [vmem:[%s3462_s3 + $0xac] sm:$0xf] }
  0xac   :  { %503 = vmatmul.bf16.vlgmr.msrb.gmra.mxu2 %v112_v5  ;;  %v2402_v5 = vld [vmem:[%s3462_s3 + $0x164] sm:$0xf]  ;;  %v1867_v0 = vor.u32 %v2369_v62, %v1866_v61  ;;  %v2010_v61 = vld [vmem:[%s3462_s3 + $0x168] sm:$0xf]  ;;  %v2405_v62 = vld [vmem:[%s3462_s3 + $0x174] sm:$0xf0] }
  0xad   :  { %v2007_v10 = vor.u32 %v2402_v5, %v2004_v7  ;;  %1080 = vmatpush.bf16.msra.mxu2 %v2083_v2  ;;  %1091 = vmatpush.bf16.msrb.mxu3 %v1863_v6  ;;  %v2090_v5 = vld [vmem:[%s3462_s3 + $0x208] sm:$0xf]  ;;  %v1851_v7 = vor.u32 %v2365_v4, %v1850_v3  ;;  %v2427_v3 = vld [vmem:[%s3462_s3 + $0x22c] sm:$0xf]  ;;  %v2108_v4 = vld [vmem:[%s3462_s3 + $0x238] sm:$0xf0] }
  0xae   :  { %1115 = vmatpush.bf16.msra.mxu1 %v1039_v63  ;;  %v2106_v63 = vld [vmem:[%s3462_s3 + $0x228] sm:$0xf] }
  0xaf   :  { %1103 = vmatpush.bf16.msrb.mxu0 %v2007_v10  ;;  %v2107_v2 = vor.u32 %v2429_v1, %v2106_v63  ;;  %v3247_v6 = vld [vmem:[%s3465_s6 + $0x1] ss:$8 sm:$0x7]  ;;  %v2091_v10 = vor.u32 %v2425_v8, %v2090_v5  ;;  %v1919_v63 = vor.u32 %v2379_v54, %v1916_v57  ;;  %v2403_v54 = vld [vmem:[%s3462_s3 + $0x16c] sm:$0xf] }
  0xb0   :  { %v181_v20 = vperm.slane %v3247_v6, 0  ;;  %v1994_v8 = vld [vmem:[%s3462_s3 + $0x148] sm:$0xf]  ;;  %v2399_v57 = vld [vmem:[%s3462_s3 + $0x14c] sm:$0xf] }
  0xb1   :  { %1125 = vmatpush.bf16.msrb.mxu2 %v1947_v14  ;;  %1092 = vmatpush.bf16.msrb.mxu3 %v1847_v17  ;;  %v1835_v14 = vor.u32 %v2361_v13, %v1834_v12 }
  0xb2   :  { %1116 = vmatpush.bf16.msra.mxu1 %v2135_v11  ;;  %v182_v11 = vperm.slane %v3247_v6, 1 }
  0xb3   :  { %1104 = vmatpush.bf16.msrb.mxu0 %v1991_v21  ;;  %v2074_v21 = vld [vmem:[%s3462_s3 + $0x1e8] sm:$0xf] }
  0xb5   :  { %1126 = vmatpush.bf16.msrb.mxu2 %v1931_v27  ;;  %1093 = vmatpush.bf16.msrb.mxu3 %v1831_v31  ;;  %v2075_v27 = vor.u32 %v2421_v22, %v2074_v21  ;;  %v2417_v31 = vld [vmem:[%s3462_s3 + $0x1d4] sm:$0xf0]  ;;  %v2423_v22 = vld [vmem:[%s3462_s3 + $0x20c] sm:$0xf] }
  0xb6   :  { %1117 = vmatpush.bf16.msra.mxu1 %v2119_v24  ;;  %v865_v24 = vunpack.c.h.b16 %v3159_v26  ;;  %v2387_v26 = vld [vmem:[%s3462_s3 + $0xec] sm:$0xf]  ;;  %v2059_v37 = vor.u32 %v2417_v31, %v2058_v30  ;;  %v1868_v31 = vld [vmem:[%s3462_s3 + $0x58] sm:$0xf0] }
  0xb7   :  { %1105 = vmatpush.bf16.msrb.mxu0 %v1975_v35  ;;  %v1948_v35 = vld [vmem:[%s3462_s3 + $0xf8] sm:$0xf0] }
  0xb8   :  { %v949_v36 = vpack.c.b16 %v865_v24, %v865_v24 }
  0xb9   :  { %1127 = vmatpush.bf16.msrb.mxu2 %v1915_v41  ;;  %1154 = vmatpush.bf16.msra.mxu3 %v1042_v42  ;;  %v1951_v41 = vor.u32 %v2387_v26, %v1948_v35  ;;  %v2383_v42 = vld [vmem:[%s3462_s3 + $0xcc] sm:$0xf]  ;;  %v1962_v35 = vld [vmem:[%s3462_s3 + $0x108] sm:$0xf] }
  0xba   :  { %1118 = vmatpush.bf16.msra.mxu1 %v2103_v40  ;;  %v2413_v40 = vld [vmem:[%s3462_s3 + $0x1b4] sm:$0xf0]  ;;  %v1045_v45 = vsel %vm1034_vm1, %v949_v36, 0  ;;  %v1935_v52 = vor.u32 %v2383_v42, %v1932_v43  ;;  %v2044_v42 = vld [vmem:[%s3462_s3 + $0x1b8] sm:$0xf0] }
  0xbb   :  { %1106 = vmatpush.bf16.msrb.mxu0 %v1959_v46  ;;  %v2435_v46 = vld [vmem:[%s3462_s3 + $0x26c] sm:$0xf]  ;;  %v2043_v49 = vor.u32 %v2413_v40, %v2042_v39  ;;  %v2393_v36 = vld [vmem:[%s3462_s3 + $0x114] sm:$0xf0]  ;;  %v1852_v40 = vld [vmem:[%s3462_s3 + $0x38] sm:$0xf0] }
  0xbc   :  { %v2363_v39 = vld [vmem:[%s3462_s3 + $0x2c] sm:$0xf]  ;;  %v1963_v43 = vor.u32 %v2393_v36, %v1962_v35  ;;  %v2454_v36 = vld [vmem:[#allocation2 + $0x80] sm:$0xff] }
  0xbd   :  { %1128 = vmatpush.bf16.msrb.mxu2 %v1899_v51  ;;  %1155 = vmatpush.bf16.msra.mxu3 %v2139_v55  ;;  %v2409_v51 = vld [vmem:[%s3462_s3 + $0x194] sm:$0xf0]  ;;  %v2143_v55 = vor.u32 %v2435_v46, %v2140_v47  ;;  %v2359_v47 = vld [vmem:[%s3462_s3 + $0xc] sm:$0xf] }
  0xbe   :  { %1119 = vmatpush.bf16.msra.mxu1 %v2087_v50  ;;  %v2026_v50 = vld [vmem:[%s3462_s3 + $0x188] sm:$0xf] }
  0xbf   :  { %v2027_v53 = vor.u32 %v2409_v51, %v2026_v50  ;;  %v2028_v50 = vld [vmem:[%s3462_s3 + $0x198] sm:$0xf0] }
  0xc1   :  { %1129 = vmatpush.bf16.msrb.mxu2 %v1883_v59  ;;  %1156 = vmatpush.bf16.msra.mxu3 %v2123_v60  ;;  %v2124_v59 = vld [vmem:[%s3462_s3 + $0x258] sm:$0xf0]  ;;  %v183_v60 = vperm.slane %v3247_v6, 2  ;;  %v2011_v6 = vor.u32 %v2405_v62, %v2010_v61  ;;  %v2391_v62 = vld [vmem:[%s3462_s3 + $0x10c] sm:$0xf] }
  0xc2   :  { %v2127_v1 = vor.u32 %v2431_v58, %v2124_v59  ;;  %v1996_v58 = vld [vmem:[%s3462_s3 + $0x158] sm:$0xf0] }
  0xc3   :  { %v1999_v59 = vor.u32 %v2399_v57, %v1996_v58  ;;  %v2462_v58 = vld [vmem:[#allocation2 + $0xc0] sm:$0xff] }
  0xc5   :  { %1130 = vmatpush.bf16.msrb.mxu2 %v1867_v0  ;;  %1157 = vmatpush.bf16.msra.mxu3 %v2107_v2  ;;  %v2375_v0 = vld [vmem:[%s3462_s3 + $0x8c] sm:$0xf]  ;;  %v1900_v2 = vld [vmem:[%s3462_s3 + $0x98] sm:$0xf0] }
  0xc9   :  { %1131 = vmatpush.bf16.msrb.mxu2 %v1851_v7  ;;  %1158 = vmatpush.bf16.msra.mxu3 %v2091_v10  ;;  %v1903_v10 = vor.u32 %v2375_v0, %v1900_v2  ;;  %v2453_v0 = vld [vmem:[#allocation2 + $0x78] sm:$0xff]  ;;  %v2452_v2 = vld [vmem:[#allocation2 + $0x70] sm:$0xff] }
  0xcd   :  { %1132 = vmatpush.bf16.msrb.mxu2 %v1835_v14  ;;  %v2371_v14 = vld [vmem:[%s3462_s3 + $0x6c] sm:$0xf] }
 0x114   :  { %v491_v9 = vpop.f32.mrf.mxu1 }
 0x119   :  { %v478_v15 = vpop.f32.mrf.mxu0 }
 0x11a   :  { %v465_v16 = vpop.f32.mrf.mxu3  ;;  %v479_v17 = vadd.f32 %v478_v15, %v182_v11  ;;  %v2111_v11 = vor.u32 %v2427_v3, %v2108_v4  ;;  %v1884_v15 = vld [vmem:[%s3462_s3 + $0x78] sm:$0xf0]  ;;  %v2444_v3 = vld [vmem:[#allocation2 + $0x30] sm:$0xff]  ;;  %v2451_v4 = vld [vmem:[#allocation2 + $0x68] sm:$0xff] }
 0x11c   :  { %v492_v18 = vadd.f32 %v491_v9, %v479_v17  ;;  %v493_v19 = vpop.f32.mrf.mxu1  ;;  %v2401_v9 = vld [vmem:[%s3462_s3 + $0x154] sm:$0xf0]  ;;  %v2076_v17 = vld [vmem:[%s3462_s3 + $0x1f8] sm:$0xf0] }
 0x11d   :  { %v1978_v19 = vld [vmem:[%s3462_s3 + $0x128] sm:$0xf] }
 0x11e   :  { %v522_v23 = vmax.f32 %v492_v18, 0.0  ;;  %v1995_v18 = vor.u32 %v2401_v9, %v1994_v8  ;;  %v2449_v8 = vld [vmem:[#allocation2 + $0x58] sm:$0xff] }
 0x11f   :  { %v452_v25 = vpop.f32.mrf.mxu2  ;;  %v2441_v9 = vld [vmem:[#allocation2 + $0x18] sm:$0xff] }
 0x120   :  { %v3267_v28 = vpack.c.bf16 %v522_v23, %v522_v23  ;;  %v453_v29 = vadd.f32 %v452_v25, %v181_v20  ;;  %v2397_v20 = vld [vmem:[%s3462_s3 + $0x134] sm:$0xf0]  ;;  %v2092_v23 = vld [vmem:[%s3462_s3 + $0x218] sm:$0xf0]  ;;  %v1887_v25 = vor.u32 %v2371_v14, %v1884_v15  ;;  %v2446_v14 = vld [vmem:[#allocation2 + $0x40] sm:$0xff] }
 0x121   :  { %v480_v32 = vpop.f32.mrf.mxu0  ;;  %v2095_v26 = vor.u32 %v2423_v22, %v2092_v23  ;;  %v2460_v15 = vld [vmem:[#allocation2 + $0xb0] sm:$0xff]  ;;  %v2457_v23 = vld [vmem:[#allocation2 + $0x98] sm:$0xff] }
 0x122   :  { %v466_v33 = vadd.f32 %v465_v16, %v453_v29  ;;  %v467_v34 = vpop.f32.mrf.mxu3  ;;  %1068 = vmatmul.bf16.vlgmr.msrb.gmra.mxu1 %v3267_v28  ;;  %v2419_v16 = vld [vmem:[%s3462_s3 + $0x1ec] sm:$0xf] }
 0x123   :  { %1138 = vmatpush.bf16.msrb.mxu1 %v2075_v27  ;;  %v2079_v27 = vor.u32 %v2419_v16, %v2076_v17  ;;  %v2367_v29 = vld [vmem:[%s3462_s3 + $0x4c] sm:$0xf]  ;;  %v1979_v34 = vor.u32 %v2397_v20, %v1978_v19  ;;  %v2438_v17 = vld [vmem:[#allocation2] sm:$0xff] }
 0x124   :  { %v521_v38 = vmax.f32 %v466_v33, 0.0  ;;  %v2415_v32 = vld [vmem:[%s3462_s3 + $0x1cc] sm:$0xf]  ;;  %v2060_v33 = vld [vmem:[%s3462_s3 + $0x1d8] sm:$0xf0]  ;;  %v2458_v19 = vld [vmem:[#allocation2 + $0xa0] sm:$0xff] }
 0x126   :  { %v3294_v44 = vpack.c.bf16 %v521_v38, %v521_v38  ;;  %v2063_v38 = vor.u32 %v2415_v32, %v2060_v33  ;;  %v2455_v32 = vld [vmem:[#allocation2 + $0x88] sm:$0xff] }
 0x127   :  { %v454_v48 = vpop.f32.mrf.mxu2  ;;  %1139 = vmatpush.bf16.msrb.mxu1 %v2059_v37  ;;  %v1871_v37 = vor.u32 %v2367_v29, %v1868_v31  ;;  %v1823_v31 = vld [vmem:[%s3465_s6 + $0x2] ss:$8 sm:$0xf] }
 0x128   :  { %1055 = vmatmul.bf16.vlgmr.msra.gmra.mxu0 %v3294_v44  ;;  %1094 = vmatmul.bf16.vlgmr.msrb.gmra.mxu3 %v3294_v44  ;;  %v1836_v48 = vld [vmem:[%s3462_s3 + $0x18] sm:$0xf0]  ;;  %v613_v33 = vperm.slane %v1823_v31, 1 }
 0x129   :  { %1164 = vmatpush.bf16.msra.mxu0 %v1951_v41  ;;  %1193 = vmatpush.bf16.msrb.mxu3 %v1045_v45  ;;  %v2411_v41 = vld [vmem:[%s3462_s3 + $0x1ac] sm:$0xf]  ;;  %v1855_v45 = vor.u32 %v2363_v39, %v1852_v40  ;;  %v1839_v51 = vor.u32 %v2359_v47, %v1836_v48  ;;  %v2465_v39 = vld [vmem:[#allocation2 + $0xd8] sm:$0xff] }
 0x12a   :  { %v517_v56 = vpop.f32.mrf.mxu3  ;;  %v2047_v46 = vor.u32 %v2411_v41, %v2044_v42 }
 0x12b   :  { %1140 = vmatpush.bf16.msrb.mxu1 %v2043_v49  ;;  %v2407_v49 = vld [vmem:[%s3462_s3 + $0x18c] sm:$0xf] }
 0x12d   :  { %1165 = vmatpush.bf16.msra.mxu0 %v1935_v52  ;;  %1194 = vmatpush.bf16.msrb.mxu3 %v2143_v55  ;;  %v2031_v52 = vor.u32 %v2407_v49, %v2028_v50  ;;  %v2012_v55 = vld [vmem:[%s3462_s3 + $0x178] sm:$0xf0] }
 0x12f   :  { %v504_v5 = vpop.f32.mrf.mxu2  ;;  %1141 = vmatpush.bf16.msrb.mxu1 %v2027_v53  ;;  %v2395_v53 = vld [vmem:[%s3462_s3 + $0x12c] sm:$0xf] }
 0x130   :  { %v505_v7 = vadd.f32 %v504_v5, %v183_v60  ;;  %v1980_v60 = vld [vmem:[%s3462_s3 + $0x138] sm:$0xf0]  ;;  %v2443_v5 = vld [vmem:[#allocation2 + $0x28] sm:$0xff] }
 0x131   :  { %1166 = vmatpush.bf16.msra.mxu0 %v1919_v63  ;;  %1195 = vmatpush.bf16.msrb.mxu3 %v2127_v1  ;;  %v1983_v61 = vor.u32 %v2395_v53, %v1980_v60  ;;  %v2445_v1 = vld [vmem:[#allocation2 + $0x38] sm:$0xff] }
 0x132   :  { %v518_v12 = vadd.f32 %v517_v56, %v505_v7  ;;  %v519_v13 = vpop.f32.mrf.mxu3  ;;  %v2015_v56 = vor.u32 %v2403_v54, %v2012_v55  ;;  %v2442_v7 = vld [vmem:[#allocation2 + $0x20] sm:$0xff]  ;;  %v2463_v54 = vld [vmem:[#allocation2 + $0xc8] sm:$0xff] }
 0x133   :  { %1142 = vmatpush.bf16.msrb.mxu1 %v2011_v6  ;;  %v2450_v6 = vld [vmem:[#allocation2 + $0x60] sm:$0xff]  ;;  %v2439_v13 = vld [vmem:[#allocation2 + $0x8] sm:$0xff] }
 0x134   :  { %v523_v21 = vmax.f32 %v518_v12, 0.0  ;;  %v2461_v12 = vld [vmem:[#allocation2 + $0xb8] sm:$0xff] }
 0x135   :  { %1167 = vmatpush.bf16.msra.mxu0 %v1903_v10  ;;  %1196 = vmatpush.bf16.msrb.mxu3 %v2111_v11  ;;  %v2440_v10 = vld [vmem:[#allocation2 + $0x10] sm:$0xff]  ;;  %v2447_v11 = vld [vmem:[#allocation2 + $0x48] sm:$0xff] }
 0x136   :  { %v526_v24 = vpack.c.bf16 %v523_v21, %v523_v21  ;;  %v2469_v21 = vld [vmem:[#allocation2 + $0xf8] sm:$0xff] }
 0x137   :  { %v506_v30 = vpop.f32.mrf.mxu2  ;;  %1143 = vmatpush.bf16.msrb.mxu1 %v1995_v18  ;;  %v2459_v18 = vld [vmem:[#allocation2 + $0xa8] sm:$0xff] }
 0x138   :  { %2144 = vmatmul.msk.bf16.vlgmr.msra.gmra.mxu2 %vm1030_vm2, %v526_v24  ;;  %1107 = vmatmul.bf16.vlgmr.msrb.gmra.mxu0 %v3267_v28  ;;  %v2467_v30 = vld [vmem:[#allocation2 + $0xe8] sm:$0xff] }
 0x139   :  { %2145 = vmatmul.msk.bf16.vlgmr.msra.gmra.mxu1 %vm1030_vm2, %v526_v24  ;;  %2146 = vmatmul.msk.bf16.vlgmr.msra.gmra.mxu3 %vm1030_vm2, %v526_v24 }
 0x13a   :  { %1168 = vmatpush.bf16.msra.mxu0 %v1887_v25  ;;  %1177 = vmatpush.bf16.msra.mxu2 %v2079_v27  ;;  %v2456_v27 = vld [vmem:[#allocation2 + $0x90] sm:$0xff] }
 0x13b   :  { %1144 = vmatpush.bf16.msrb.mxu1 %v1979_v34  ;;  %1197 = vmatpush.bf16.msrb.mxu3 %v2095_v26  ;;  %v2466_v34 = vld [vmem:[#allocation2 + $0xe0] sm:$0xff]  ;;  %v612_v26 = vperm.slane %v1823_v31, 0 }
 0x13e   :  { %1169 = vmatpush.bf16.msra.mxu0 %v1871_v37  ;;  %1178 = vmatpush.bf16.msra.mxu2 %v2063_v38 }
 0x13f   :  { %1145 = vmatpush.bf16.msrb.mxu1 %v1963_v43  ;;  %1494 = vmatpush.bf16.msra.mxu3 %v2461_v12  ;;  %v2464_v43 = vld [vmem:[#allocation2 + $0xd0] sm:$0xff] }
 0x142   :  { %1170 = vmatpush.bf16.msra.mxu0 %v1855_v45  ;;  %1179 = vmatpush.bf16.msra.mxu2 %v2047_v46 }
 0x143   :  { %1468 = vmatpush.bf16.msra.mxu1 %v2445_v1  ;;  %1495 = vmatpush.bf16.msra.mxu3 %v2460_v15 }
 0x146   :  { %1171 = vmatpush.bf16.msra.mxu0 %v1839_v51  ;;  %1180 = vmatpush.bf16.msra.mxu2 %v2031_v52 }
 0x147   :  { %1469 = vmatpush.bf16.msra.mxu1 %v2444_v3  ;;  %1496 = vmatpush.bf16.msra.mxu3 %v2459_v18  ;;  %v2475_v18 = vld [vmem:[#allocation5 + $0x28] sm:$0xff] }
 0x148   :  { %1133 = vmatmul.bf16.vlgmr.msrb.gmra.mxu2 %v3294_v44 }
 0x149   :  { %1146 = vmatmul.bf16.vlgmr.msrb.gmra.mxu1 %v3267_v28  ;;  %1172 = vmatmul.bf16.vlgmr.msra.gmra.mxu0 %v3294_v44  ;;  %v1964_v44 = vld [vmem:[%s3462_s3 + $0x118] sm:$0xf0] }
 0x14a   :  { %2147 = vmatmul.msk.bf16.vlgmr.msrb.gmra.mxu3 %vm1030_vm2, %v526_v24  ;;  %1181 = vmatpush.bf16.msra.mxu2 %v2015_v56  ;;  %v1967_v63 = vor.u32 %v2391_v62, %v1964_v44  ;;  %v2468_v24 = vld [vmem:[#allocation2 + $0xf0] sm:$0xff]  ;;  %v614_v62 = vperm.slane %v1823_v31, 2 }
 0x14b   :  { %1481 = vmatpush.bf16.msrb.mxu0 %v2453_v0  ;;  %1470 = vmatpush.bf16.msra.mxu1 %v2443_v5 }
 0x14c   :  { %1497 = vmatpush.bf16.msra.mxu3 %v2458_v19  ;;  %v2474_v19 = vld [vmem:[#allocation5 + $0x20] sm:$0xff] }
 0x14e   :  { %1182 = vmatpush.bf16.msra.mxu2 %v1999_v59 }
 0x14f   :  { %1482 = vmatpush.bf16.msrb.mxu0 %v2452_v2  ;;  %1471 = vmatpush.bf16.msra.mxu1 %v2442_v7 }
 0x150   :  { %1498 = vmatpush.bf16.msra.mxu3 %v2457_v23  ;;  %v2472_v23 = vld [vmem:[#allocation5 + $0x10] sm:$0xff] }
 0x152   :  { %1183 = vmatpush.bf16.msra.mxu2 %v1983_v61 }
 0x153   :  { %1483 = vmatpush.bf16.msrb.mxu0 %v2451_v4  ;;  %1472 = vmatpush.bf16.msra.mxu1 %v2441_v9  ;;  %v615_v9 = vperm.slane %v1823_v31, 3  ;;  %v1275_v31 = vld [vmem:[%s3465_s6 + $0x3] ss:$0 sm:$0xff] }
 0x154   :  { %1499 = vmatpush.bf16.msra.mxu3 %v2456_v27  ;;  %v2471_v27 = vld [vmem:[#allocation5 + $0x8] sm:$0xff] }
 0x156   :  { %1184 = vmatpush.bf16.msra.mxu2 %v1967_v63 }
 0x157   :  { %1484 = vmatpush.bf16.msrb.mxu0 %v2450_v6  ;;  %1473 = vmatpush.bf16.msra.mxu1 %v2440_v10 }
 0x158   :  { %1500 = vmatpush.bf16.msra.mxu3 %v2455_v32 }
 0x159   :  { %1185 = vmatmul.bf16.vlgmr.msra.gmra.mxu2 %v3267_v28  ;;  %v2448_v28 = vld [vmem:[#allocation2 + $0x50] sm:$0xff] }
 0x15a   :  { %1507 = vmatpush.bf16.msrb.mxu2 %v2469_v21  ;;  %v2473_v21 = vld [vmem:[#allocation5 + $0x18] sm:$0xff] }
 0x15b   :  { %1485 = vmatpush.bf16.msrb.mxu0 %v2449_v8  ;;  %1474 = vmatpush.bf16.msra.mxu1 %v2439_v13 }
 0x15c   :  { %1501 = vmatpush.bf16.msra.mxu3 %v2454_v36 }
 0x15e   :  { %1508 = vmatpush.bf16.msrb.mxu2 %v2468_v24 }
 0x15f   :  { %1486 = vmatpush.bf16.msrb.mxu0 %v2448_v28  ;;  %1475 = vmatpush.bf16.msra.mxu1 %v2438_v17  ;;  %v2476_v17 = vld [vmem:[#allocation5 + $0x30] sm:$0xff] }
 0x162   :  { %1509 = vmatpush.bf16.msrb.mxu2 %v2467_v30 }
 0x163   :  { %1487 = vmatpush.bf16.msrb.mxu0 %v2447_v11 }
 0x166   :  { %1510 = vmatpush.bf16.msrb.mxu2 %v2466_v34 }
 0x167   :  { %1488 = vmatpush.bf16.msrb.mxu0 %v2446_v14 }
 0x16a   :  { %1511 = vmatpush.bf16.msrb.mxu2 %v2465_v39 }
 0x16e   :  { %1512 = vmatpush.bf16.msrb.mxu2 %v2464_v43 }
 0x172   :  { %1513 = vmatpush.bf16.msrb.mxu2 %v2463_v54 }
 0x176   :  { %1514 = vmatpush.bf16.msrb.mxu2 %v2462_v58 }
 0x19f   :  { %v1069_v16 = vpop.f32.mrf.mxu1 }
 0x1a5   :  { %v1056_v20 = vpop.f32.mrf.mxu0 }
 0x1a6   :  { %v1057_v40 = vadd.f32 %v1056_v20, %v612_v26 }
 0x1a7   :  { %v1071_v22 = vpop.f32.mrf.mxu1 }
 0x1a8   :  { %v1070_v47 = vadd.f32 %v1069_v16, %v1057_v40  ;;  %v2477_v16 = vld [vmem:[#allocation5 + $0x38] sm:$0xff]  ;;  %v1538_v40 = vld [vmem:[%s3465_s6 + $0x4] ss:$0 sm:$0xff] }
 0x1a9   :  { %1587 = vmatpush.bf16.msrb.mxu1 %v2477_v16 }
 0x1ab   :  { %v1095_v25 = vpop.f32.mrf.mxu3 }
 0x1ac   :  { %v1096_v37 = vadd.f32 %v1095_v25, %v613_v33 }
 0x1ad   :  { %v1058_v29 = vpop.f32.mrf.mxu0  ;;  %1588 = vmatpush.bf16.msrb.mxu1 %v2476_v17 }
 0x1ae   :  { %v2470_v29 = vld [vmem:[#allocation5] sm:$0xff] }
 0x1b1   :  { %1589 = vmatpush.bf16.msrb.mxu1 %v2475_v18 }
 0x1b3   :  { %v1097_v35 = vpop.f32.mrf.mxu3 }
 0x1b5   :  { %v1108_v38 = vpop.f32.mrf.mxu0  ;;  %1590 = vmatpush.bf16.msrb.mxu1 %v2474_v19 }
 0x1b6   :  { %v1109_v41 = vadd.f32 %v1108_v38, %v1096_v37  ;;  %v1121_v42 = vpop.f32.mrf.mxu1 }
 0x1b8   :  { %v1122_v45 = vadd.f32 %v1121_v42, %v1109_v41 }
 0x1b9   :  { %1591 = vmatpush.bf16.msrb.mxu1 %v2473_v21 }
 0x1ba   :  { %v1204_v46 = vmax.f32 %v1122_v45, 0.0 }
 0x1bb   :  { %v1082_v48 = vpop.f32.mrf.mxu2 }
 0x1bc   :  { %v1208_v49 = vpack.c.bf16 %v1204_v46, %v1204_v46  ;;  %v1083_v50 = vadd.f32 %v1082_v48, %v1070_v47  ;;  %v1160_v51 = vpop.f32.mrf.mxu3 }
 0x1bd   :  { %v1110_v52 = vpop.f32.mrf.mxu0  ;;  %1592 = vmatpush.bf16.msrb.mxu1 %v2472_v23 }
 0x1be   :  { %v1203_v55 = vmax.f32 %v1083_v50, 0.0  ;;  %v1123_v56 = vpop.f32.mrf.mxu1  ;;  %1489 = vmatmul.bf16.vlgmr.msrb.gmra.mxu0 %v1208_v49 }
 0x1c0   :  { %v1207_v57 = vpack.c.bf16 %v1203_v55, %v1203_v55 }
 0x1c1   :  { %1593 = vmatpush.bf16.msrb.mxu1 %v2471_v27 }
 0x1c2   :  { %1476 = vmatmul.bf16.vlgmr.msra.gmra.mxu1 %v1207_v57 }
 0x1c3   :  { %v1084_v59 = vpop.f32.mrf.mxu2 }
 0x1c4   :  { %v1162_v53 = vpop.f32.mrf.mxu3 }
 0x1c5   :  { %1594 = vmatpush.bf16.msrb.mxu1 %v2470_v29 }
 0x1c6   :  { %v1147_v60 = vpop.f32.mrf.mxu1  ;;  %v1173_v61 = vpop.f32.mrf.mxu0 }
 0x1c7   :  { %v1174_v28 = vadd.f32 %v1173_v61, %v615_v9 }
 0x1cb   :  { %v1134_v44 = vpop.f32.mrf.mxu2 }
 0x1cc   :  { %v1135_v63 = vadd.f32 %v1134_v44, %v614_v62 }
 0x1cd   :  { %v1199_v0 = vpop.f32.mrf.mxu3 }
 0x1ce   :  { %v1148_v1 = vadd.f32 %v1147_v60, %v1135_v63  ;;  %v1149_v2 = vpop.f32.mrf.mxu1  ;;  %v1175_v3 = vpop.f32.mrf.mxu0 }
 0x1d0   :  { %v1161_v4 = vadd.f32 %v1160_v51, %v1148_v1 }
 0x1d2   :  { %v1205_v5 = vmax.f32 %v1161_v4, 0.0 }
 0x1d3   :  { %v1136_v6 = vpop.f32.mrf.mxu2 }
 0x1d4   :  { %v1209_v7 = vpack.c.bf16 %v1205_v5, %v1205_v5 }
 0x1d5   :  { %v1201_v8 = vpop.f32.mrf.mxu3 }
 0x1d6   :  { %1502 = vmatmul.bf16.vlgmr.msra.gmra.mxu3 %v1209_v7 }
 0x1dc   :  { %v1186_v10 = vpop.f32.mrf.mxu2 }
 0x1dd   :  { %v1187_v11 = vadd.f32 %v1186_v10, %v1174_v28 }
 0x1df   :  { %v1200_v12 = vadd.f32 %v1199_v0, %v1187_v11 }
 0x1e1   :  { %v1206_v13 = vmax.f32 %v1200_v12, 0.0 }
 0x1e3   :  { %v1210_v14 = vpack.c.bf16 %v1206_v13, %v1206_v13 }
 0x1e4   :  { %v1188_v15 = vpop.f32.mrf.mxu2 }
 0x1e5   :  { %1515 = vmatmul.bf16.vlgmr.msrb.gmra.mxu2 %v1210_v14 }
 0x23b   :  { %v1490_v20 = vpop.f32.mrf.mxu0 }
 0x23f   :  { %v1477_v22 = vpop.f32.mrf.mxu1 }
 0x240   :  { %v1478_v32 = vadd.f32 %v1477_v22, %v1275_v31 }
 0x242   :  { %v1491_v34 = vadd.f32 %v1490_v20, %v1478_v32 }
 0x243   :  { %v1492_v24 = vpop.f32.mrf.mxu0 }
 0x247   :  { %v1479_v25 = vpop.f32.mrf.mxu1 }
 0x259   :  { %v1503_v30 = vpop.f32.mrf.mxu3 }
 0x25a   :  { %v1504_v26 = vadd.f32 %v1503_v30, %v1491_v34 }
 0x261   :  { %v1505_v33 = vpop.f32.mrf.mxu3 }
 0x268   :  { %v1516_v35 = vpop.f32.mrf.mxu2 }
 0x269   :  { %v1517_v36 = vadd.f32 %v1516_v35, %v1504_v26 }
 0x26b   :  { %v1520_v37 = vmax.f32 %v1517_v36, 0.0 }
 0x26d   :  { %v1521_v38 = vpack.c.bf16 %v1520_v37, %v1520_v37 }
 0x26f   :  { %1595 = vmatmul.bf16.vlgmr.msrb.gmra.mxu1 %v1521_v38 }
 0x270   :  { %v1518_v39 = vpop.f32.mrf.mxu2 }
 0x2ec   :  { %v1596_v41 = vpop.f32.mrf.mxu1 }
 0x2ed   :  { %v1597_v42 = vadd.f32 %v1596_v41, %v1538_v40 }
 0x2ef   :  { %v1600_v43 = vmax.f32 %v1597_v42, 0.0 }
 0x2f1   :  { %1601 = vst [vmem:[#allocation7] sm:$0xff] %v1600_v43 }
 0x2f2   :  { %1612 = dma.vmem_to_hbm [thread:$0]  %s1608_s22, 128, %s1610_s25, [#allocation4]  }
 0x2f4   :  { %v1598_v45 = vpop.f32.mrf.mxu1 }
 0x2f5   :  { %2559 = dma.done.wait [#allocation4], 128  }
 0x2f6   :  { %2560 = vsyncadd [#allocation4], 4294967168 }
 0x2f7   :  { %1617 = vsyncpa [#allocation3], 1 }
 0x2f8   :  { %1618 = vsyncpa [#allocation6], 1 }
 0x2f9   :  { %1619 = vsyncpa [#allocation4], 1 }

</bundles_post_ra>
